<compile_context>
chip_gen: v6e
topology: v6e:2x2x1
jax: 0.10.0
libtpu: 0.0.40
codegen_flags: <defaults>
</compile_context>

<pallas_src>
import jax
import jax.numpy as jnp
from jax.experimental import pallas as pl
from jax.experimental.pallas import tpu as pltpu


def _round_up(v, m):
    return ((v + m - 1) // m) * m


def _cdiv(a, b):
    return -(-a // b)


def _device_kind():
    try:
        return jax.devices()[0].device_kind.lower()
    except Exception:
        return ""


def _is_v7x():
    k = _device_kind()
    return ("v7" in k) or ("7x" in k)


def _make_row_sum_kernel(red_axis):
    def kernel(x_ref, o_ref):
        # x_ref: (tm, dim) input tile in VMEM (tm is a multiple of 8).
        # o_ref: (8, dim) f32 per-sublane partial sums, resident across the
        #        reduction grid axis `red_axis`.
        @pl.when(pl.program_id(red_axis) == 0)
        def _init():
            o_ref[...] = jnp.zeros_like(o_ref)

        tm, d = x_ref.shape
        xs = x_ref[...].astype(jnp.float32)
        # Per-sublane partials: (tm, d) -> (tm//8, 8, d) is a layout-preserving
        # split of the sublane-major axis; the axis-0 sum is plain VALU adds of
        # resident vregs (no cross-sublane XLU reduce, no broadcast stores).
        o_ref[...] += xs.reshape(tm // 8, 8, d).sum(axis=0)

    return kernel


def _row_sum_2d(x, num_splits, max_tile_bytes):
    """Pallas streaming row-sum of a 2-D array -> (1, dim) float32.

    The grid covers only whole (tm, dim) tiles; the (short) ragged tail of
    fewer than num_splits*tm rows is summed by XLA and added afterwards, so
    the large input is never padded or copied host-side.
    """
    n, dim = x.shape
    itemsize = x.dtype.itemsize
    pack = max(1, 4 // itemsize)      # sublane packing: f32 -> 1, bf16 -> 2, int8 -> 4
    row_align = 8 * pack              # native tile height for this dtype

    # Budget against the *padded* VMEM footprint: lanes round up to 128 and the
    # kernel works on an f32 view of the tile.
    padded_row_bytes = _round_up(dim, 128) * 4
    in_row_bytes = _round_up(dim, 128) * itemsize

    vmem_target = 48 * 1024 * 1024    # headroom below v7x's 64 MiB physical VMEM
    per_row_vmem = 2 * in_row_bytes + padded_row_bytes  # double-buffered in + f32 copy
    tm = min(max_tile_bytes // padded_row_bytes,
             (vmem_target - (2 << 20)) // per_row_vmem)
    tm = max(row_align, (tm // row_align) * row_align)
    tm = min(tm, _round_up(_cdiv(n, num_splits), row_align))

    tiles_per_split = (n // tm) // num_splits
    if tiles_per_split == 0:
        # Less than one full tile per split: XLA sum is faster than a launch.
        return jnp.sum(x.astype(jnp.float32), axis=0, keepdims=True)

    n_main = num_splits * tiles_per_split * tm

    if num_splits > 1:
        nt = tiles_per_split
        grid = (num_splits, nt)
        in_spec = pl.BlockSpec((tm, dim), lambda c, i: (c * nt + i, 0))
        out_spec = pl.BlockSpec((8, dim), lambda c, i: (c, 0))
        red_axis = 1
        if _is_v7x():
            # Only CORE_PARALLEL actually shards a grid axis across v7x's two
            # TensorCores; fall back to plain "parallel" if it is rejected.
            semantics_try = [
                (getattr(pltpu, "CORE_PARALLEL", "parallel"), "arbitrary"),
                ("parallel", "arbitrary"),
            ]
        else:
            semantics_try = [("parallel", "arbitrary")]
    else:
        grid = (tiles_per_split,)
        in_spec = pl.BlockSpec((tm, dim), lambda i: (i, 0))
        out_spec = pl.BlockSpec((8, dim), lambda i: (0, 0))
        red_axis = 0
        semantics_try = [("arbitrary",)]

    def run(sem):
        return pl.pallas_call(
            _make_row_sum_kernel(red_axis),
            out_shape=jax.ShapeDtypeStruct((num_splits * 8, dim), jnp.float32),
            grid_spec=pltpu.PrefetchScalarGridSpec(
                num_scalar_prefetch=0,
                grid=grid,
                in_specs=[in_spec],
                out_specs=out_spec,
            ),
            compiler_params=pltpu.CompilerParams(
                dimension_semantics=sem,
                vmem_limit_bytes=vmem_target,
            ),
            cost_estimate=pl.CostEstimate(
                flops=int(n_main) * int(dim),
                transcendentals=0,
                bytes_accessed=int(n_main) * int(dim) * int(itemsize)
                + int(num_splits) * 8 * int(dim) * 4,
            ),
        )(x)

    partial = None
    last_err = None
    for sem in semantics_try:
        try:
            partial = run(sem)
            break
        except Exception as e:  # pragma: no cover - v7x CORE_PARALLEL fallback only
            last_err = e
    if partial is None:
        raise last_err

    # Reduce splits and the 8 per-sublane partials once, in the wrapper.
    total = jnp.sum(partial, axis=0, keepdims=True)  # (1, dim) f32

    if n_main < n:
        # Ragged tail (< num_splits*tm rows): tiny XLA sum, avoids padding x.
        total = total + jnp.sum(x[n_main:].astype(jnp.float32), axis=0, keepdims=True)
    return total


def row_sum_pallas(x, *, num_splits=None, max_tile_bytes=8 * 1024 * 1024,
                   min_pallas_bytes=1 << 20):
    """Sum over the rows of x, returned as a (1, dim) float32 array."""
    n, dim = x.shape
    if num_splits is None:
        num_splits = 2 if _is_v7x() else 1
    if n == 0:
        return jnp.zeros((1, dim), jnp.float32)

    # Small-input fast path: launch + DMA setup would dwarf the work.
    if n * dim * x.dtype.itemsize < min_pallas_bytes:
        return jnp.sum(x.astype(jnp.float32), axis=0, keepdims=True)

    # Lane folding: for dim < 128 a (8,128) tile would be mostly empty lanes.
    # Fold `fold` consecutive rows into one lane-dense row (contiguous row-major
    # reshape), run the kernel, and un-fold with a tiny (fold, dim) sum.
    fold = max(1, 128 // dim) if dim < 128 else 1
    if fold > 1:
        pad = (-n) % fold
        if pad:
            x = jnp.pad(x, ((0, pad), (0, 0)))  # zero rows do not change the sum
        xf = x.reshape(x.shape[0] // fold, fold * dim)
        folded = _row_sum_2d(xf, num_splits, max_tile_bytes)  # (1, fold*dim)
        return jnp.sum(folded.reshape(fold, dim), axis=0, keepdims=True)

    return _row_sum_2d(x, num_splits, max_tile_bytes)


def linear_module_forward(x, weight, bias, states, **row_sum_kwargs):
    """JAX/Pallas equivalent of Linear.forward.

    weight: (out_dim, dim) like torch.nn.Linear.weight (out_dim = states-1, or 1 if states==1)
    bias:   (out_dim,)
    """
    n = x.shape[0]
    rowsum = row_sum_pallas(x, **row_sum_kwargs)  # (1, dim) f32, Pallas streaming reduction
    # sum_n (x_n @ W.T + b) == (sum_n x_n) @ W.T + N * b   (exact; tiny matmul = XLA glue)
    summed = rowsum @ weight.astype(jnp.float32).T + jnp.float32(n) * bias.astype(jnp.float32)
    summed = summed.reshape(1, -1)
    if states == 1:
        return summed                                                           # (1, 1)
    return jnp.concatenate([jnp.zeros((1, 1), summed.dtype), summed], axis=1)   # (1, states)


def _reference(x, weight, bias, states):
    y = x.astype(jnp.float32) @ weight.astype(jnp.float32).T + bias.astype(jnp.float32)
    s = jnp.sum(y, axis=-2, keepdims=True)
    if states == 1:
        return s
    return jnp.concatenate([jnp.zeros((1, 1), s.dtype), s], axis=1)


if __name__ == "__main__":
    key = jax.random.PRNGKey(0)
    kx, kw, kb, k2, k3, k4 = jax.random.split(key, 6)

    # 1) Module-sized input, states > 1 (small: exercises the XLA fast path + glue).
    N, dim, states = 8, 32, 5
    x = jax.random.normal(kx, (N, dim), dtype=jnp.float32)
    w = 0.1 * jax.random.normal(kw, (states - 1, dim), dtype=jnp.float32)
    b = 0.1 * jax.random.normal(kb, (states - 1,), dtype=jnp.float32)
    out = linear_module_forward(x, w, b, states)
    jax.block_until_ready(out)
    ref = _reference(x, w, b, states)
    assert out.shape == (1, states), out.shape
    assert jnp.allclose(out, ref, atol=1e-4, rtol=1e-4), (out, ref)

    # 2) states == 1 case.
    w1 = 0.1 * jax.random.normal(kw, (1, dim), dtype=jnp.float32)
    b1 = 0.1 * jax.random.normal(kb, (1,), dtype=jnp.float32)
    out1 = linear_module_forward(x, w1, b1, 1)
    jax.block_until_ready(out1)
    assert out1.shape == (1, 1), out1.shape
    assert jnp.allclose(out1, _reference(x, w1, b1, 1), atol=1e-4, rtol=1e-4), out1

    # 3) Module forward forced through the Pallas kernel: dim=32 -> lane folding (k=4),
    #    262 rows -> fold padding + multi-tile accumulation + ragged XLA tail.
    Nb = 262
    xb = jax.random.normal(k2, (Nb, dim), dtype=jnp.float32)
    out_p = linear_module_forward(xb, w, b, states,
                                  min_pallas_bytes=0, max_tile_bytes=8 * 1024)
    jax.block_until_ready(out_p)
    ref_p = _reference(xb, w, b, states)
    assert out_p.shape == (1, states), out_p.shape
    assert jnp.allclose(out_p, ref_p, atol=1e-3, rtol=1e-3), (out_p, ref_p)

    # 4) bf16 input (dtype-aware row alignment), direct row-sum check.
    xh = jax.random.normal(k3, (128, 256), dtype=jnp.float32).astype(jnp.bfloat16)
    rs = row_sum_pallas(xh, min_pallas_bytes=0, max_tile_bytes=32 * 1024)
    jax.block_until_ready(rs)
    ref_rs = jnp.sum(xh.astype(jnp.float32), axis=0, keepdims=True)
    assert jnp.allclose(rs, ref_rs, atol=1e-2, rtol=1e-2), (rs, ref_rs)

    # 5) Explicit 2-way split (2-D grid path; CORE_PARALLEL with fallback on v7x).
    xs2 = jax.random.normal(k4, (256, 256), dtype=jnp.float32)
    rs2 = row_sum_pallas(xs2, num_splits=2, min_pallas_bytes=0, max_tile_bytes=32 * 1024)
    jax.block_until_ready(rs2)
    assert jnp.allclose(rs2, jnp.sum(xs2, axis=0, keepdims=True), atol=1e-3, rtol=1e-3)

    print("KERNEL_OK")
</pallas_src>

<mosaic_0001>
module attributes {stable_mosaic.version = 11 : i64} {
  func.func @kernel(%arg0: i32, %arg1: memref<16x128xf32, #tpu.memory_space<vmem>>, %arg2: memref<8x128xf32, #tpu.memory_space<vmem>>) attributes {dimension_semantics = [#tpu.dimension_semantics<arbitrary>], iteration_bounds = array<i64: 4>, scalar_prefetch = 0 : i64, scratch_operands = 0 : i64, tpu.core_type = #tpu.core_type<tc>, window_params = [{transform_indices = @transform_0, window_bounds = array<i64: 16, 128>}, {pipeline_mode = #tpu.pipeline_mode<synchronous>, transform_indices = @transform_1, window_bounds = array<i64: 8, 128>}]} {
    %c0_i32 = arith.constant 0 : i32
    %0 = arith.cmpi eq, %arg0, %c0_i32 : i32
    %1 = arith.extui %0 : i1 to i32
    %c0_i32_0 = arith.constant 0 : i32
    %2 = arith.cmpi ne, %1, %c0_i32_0 : i32
    scf.if %2 {
      %cst_6 = arith.constant 0.000000e+00 : f32
      %9 = vector.broadcast %cst_6 : f32 to vector<8x128xf32>
      %c0_7 = arith.constant 0 : index
      %c0_8 = arith.constant 0 : index
      %10 = vector.load %arg2[%c0_7, %c0_8] : memref<8x128xf32, #tpu.memory_space<vmem>>, vector<8x128xf32>
      tpu.vector_store %arg2[%c0_7, %c0_8], %9 {strides = array<i32>} : memref<8x128xf32, #tpu.memory_space<vmem>>, vector<8x128xf32>,
    } else {
    }
    %c0 = arith.constant 0 : index
    %c0_1 = arith.constant 0 : index
    %3 = vector.load %arg1[%c0, %c0_1] : memref<16x128xf32, #tpu.memory_space<vmem>>, vector<16x128xf32>
    %c0_2 = arith.constant 0 : index
    %c0_3 = arith.constant 0 : index
    %4 = vector.load %arg2[%c0_2, %c0_3] : memref<8x128xf32, #tpu.memory_space<vmem>>, vector<8x128xf32>
    %5 = vector.shape_cast %3 : vector<16x128xf32> to vector<2x8x128xf32>
    %cst = arith.constant dense<0.000000e+00> : vector<8x128xf32>
    %6 = vector.multi_reduction <add>, %5, %cst [0] : vector<2x8x128xf32> to vector<8x128xf32>
    %7 = arith.addf %4, %6 : vector<8x128xf32>
    %c0_4 = arith.constant 0 : index
    %c0_5 = arith.constant 0 : index
    %8 = vector.load %arg2[%c0_4, %c0_5] : memref<8x128xf32, #tpu.memory_space<vmem>>, vector<8x128xf32>
    tpu.vector_store %arg2[%c0_4, %c0_5], %7 {strides = array<i32>} : memref<8x128xf32, #tpu.memory_space<vmem>>, vector<8x128xf32>,
    return
  }
  func.func @transform_0(%arg0: i32) -> (i32, i32) {
    %c0_i32 = arith.constant 0 : i32
    %c0_i32_0 = arith.constant 0 : i32
    return %arg0, %c0_i32 : i32, i32
  }
  func.func @transform_1(%arg0: i32) -> (i32, i32) {
    %c0_i32 = arith.constant 0 : i32
    %c0_i32_0 = arith.constant 0 : i32
    %c0_i32_1 = arith.constant 0 : i32
    return %c0_i32, %c0_i32_0 : i32, i32
  }
}

</mosaic_0001>

<bundles_post_ra>
// kernel: tpu_custom_call.1
= control target key start
LH: loop header
LB: loop body
LE: loop exit
PB: predicated region body
PF: predicated region fallthrough
CT: control target
= control target key end

     0   :  { %6 = vsyncpa [#allocation3], 0  ;;  %s482_s0 = inlined_call_operand.hbm [shape: f32[66,128], index: 0, kind: input, shape index: {}]   ;;  %s483_s1 = inlined_call_operand.hbm [shape: f32[8,128], index: 1, kind: output, shape index: {}]  }
   0x1   :  { %8 = vsyncpa [#allocation3 + $0x1], 0 }
   0x2   :  { %9 = vsyncpa [#allocation4], 0  ;;  %s368_s6 = smov 0   ;;  %s370_s7 = smov 0  }
   0x3   :  { %s372_s8 = smov 0   ;;  %s374_s9 = smov 0  }
   0x4 LB: > { %s387_s10 = sadd.s32 4294967295, %s351_s9   ;;  %s390_s11 = sadd.s32 1, %s351_s9   ;;  %s351_s9 = sphi %s374_s9, %s488_s9   ;;  %s347_s8 = sphi %s372_s8, %s487_s8   ;;  %s343_s7 = sphi %s370_s7, %s486_s7   ;;  %s339_s6 = sphi %s368_s6, %s485_s6  }
   0x5   : > { %s19_s12 = ssub.s32 %s351_s9, %s390_s11  ;;  %s22_s13 = sadd.s32 1, %s347_s8 }
   0x6   : > { %p20_p0 = scmp.eq.s32.totalorder %s19_s12, 0  ;;  %p29_p1 = scmp.ne.s32.totalorder %s347_s8, %s343_s7 }
   0x7   : > { %p30_p2 = scmp.eq.s32.totalorder %s351_s9, 0  ;;  %p35_p3 = scmp.ne.s32.totalorder %s343_s7, %s339_s6 }
   0x8   : > { %s400_s14 = scalar_select %p20_p0, %s347_s8, %s22_s13  }
   0x9   : > { %p31_p4 = por %p30_p2, %p29_p1  ;;  %p36_p5 = scmp.eq.s32.totalorder %s387_s10, 0 }
   0xa   : > { %p204_p7 = scmp.ge.s32.totalorder %s351_s9, 4 }
   0xb   : > { %p403_p6 = por %p36_p5, %p35_p3 }
   0xc   : > { %76 = sbr.rel (%p204_p7) target bundleno = 49 (0x31), region = 16 }
  0x11   : > { %79 = sbr.rel (!%p31_p4) target bundleno = 49 (0x31), region = 20  ;;  %s80_s16 = sand.u32 (%p31_p4), 1, %s347_s8  }
  0x12   : > { %s206_s17 = sshll.u32 (%p31_p4), %s351_s9, 1  ;;  %s205_s18 = sshll.u32 (%p31_p4), %s80_s16, 4 }
  0x13   : > { %s86_s19 = ssub.s32 (%p31_p4), 9, %s206_s17  ;;  %s413_s22 = scalar_lea.sflag (%p31_p4), [#allocation3], %s80_s16 }
  0x14   : > { %p87_p8 = scmp.lt.s32.totalorder (%p31_p4), %s86_s19, 2  ;;  %s84_s23 = scalar_lea.vmem (%p31_p4), [#allocation2], %s205_s18 }
  0x16   : > { %s490_s19 = smov (!%p87_p8, %s86_s19), 2 }
  0x17   : > { %s410_s20 = sshll.u32 %s490_s19, 7 }
  0x18   : > { %s91_s21 = ssub.s32 256, %s410_s20 }
  0x19   : > { %92 = vsyncadd %s413_s22, %s91_s21  ;;  %p208_p9 = scmp.ne.s32.totalorder %s410_s20, 0  ;;  %s219_s24 = sshll.u32 %s351_s9, 8 }
  0x1a   : > { %s421_s27 = scalar_lea.hbm %s482_s0, %s219_s24  ;;  %s97_s28 = sshll.u32 %s84_s23, 4  ;;  %s423_s28 = int_to_ptr.vmem [resolvable:$true] %s97_s28 }
  0x1b   : > { %s263_s29 = scalar_lea.hbm %s421_s27, %s410_s20  ;;  %s267_s3 = scalar_lea.hbm %s482_s0, 1152 }
  0x1c   : > { %p264_p10 = scmp.ne.s32.totalorder %s421_s27, %s263_s29  ;;  %p268_p13 = scmp.lt.s32.totalorder %s421_s27, %s482_s0 }
  0x1d   : > { %p269_p0 = scmp.lt.s32.totalorder %s267_s3, %s263_s29 }
  0x1e   : > { %p265_p11 = pnand %p264_p10, %p208_p9 }
  0x1f   : > { %p270_p1 = por %p269_p0, %p268_p13 }
  0x20   : > { %p266_p12 = pneg %p265_p11 }
  0x22   : > { %p271_p2 = pnand %p270_p1, %p266_p12 }
  0x24   : > { %274 = shalt.err (!%p271_p2)
}
  0x25   : > { %s275_s6 = scalar_lea.vmem %s423_s28, %s410_s20  ;;  %s353_s12 = smov [#allocation2]  }
  0x26   : > { %p276_p3 = scmp.ne.s32.totalorder %s423_s28, %s275_s6  ;;  %s279_s13 = sshll.u32 %s353_s12, 4  ;;  %s280_s13 = int_to_ptr.vmem [resolvable:$false] %s279_s13 }
  0x27   : > { %s281_s16 = scalar_lea.vmem %s280_s13, 512  ;;  %p282_p7 = scmp.lt.s32.totalorder %s423_s28, %s280_s13 }
  0x28   : > { %p277_p4 = pnand %p276_p3, %p208_p9  ;;  %p283_p8 = scmp.lt.s32.totalorder %s281_s16, %s275_s6 }
  0x2a   : > { %p278_p5 = pneg %p277_p4  ;;  %p284_p10 = por %p283_p8, %p282_p7 }
  0x2c   : > { %p285_p11 = pnand %p284_p10, %p278_p5 }
  0x2e   : > { %288 = shalt.err (!%p285_p11)
}
  0x2f   : > { %s354_s17 = smov 128   ;;  %s355_s18 = smov 8  }
  0x30   : > { %103 = dma.hbm_to_vmem [thread:$0]  (%p208_p9), %s421_s27, %s410_s20, %s423_s28, %s413_s22, %s354_s17, %s354_s17, %s355_s18  }
  0x31 PF: > { %p212_p12 = scmp.ge.s32.totalorder %s351_s9, 1  ;;  %p105_p13 = scmp.lt.s32.totalorder %s351_s9, 5 }
  0x33   : > { %p106_p0 = pnand %p212_p12, %p105_p13 }
  0x34   : > { %s111_s19 = sand.u32 (!%p106_p0), 1, %s343_s7  }
  0x35   : > { %109 = sbr.rel (%p106_p0) target bundleno = 83 (0x53), region = 24  ;;  %s213_s21 = sshll.u32 (!%p106_p0), %s111_s19, 4 }
  0x36   : > { %s112_s23 = scalar_lea.sflag (!%p106_p0), [#allocation3], %s111_s19  ;;  %s115_s24 = scalar_lea.vmem (!%p106_p0), [#allocation2], %s213_s21 }
  0x3a   : > { %330 = dma.done.wait (%p403_p6), %s112_s23, 256  }
  0x3b   : > { %332 = vsyncadd (%p403_p6), %s112_s23, 4294967040  ;;  %p214_p9 = scmp.ne.s32.totalorder %s387_s10, 0 }
  0x3d   : > { %137 = sbr.rel (%p214_p9) target bundleno = 68 (0x44), region = 32 }
  0x42   : > { %v356_v0 = vmov 0.0  }
  0x43   : > { %138 = vst [vmem:[#allocation5] sm:$0xff] %v356_v0 }
  0x44 PF: > { %v139_v1 = vld [vmem:[%s115_s24] sm:$0xff]  ;;  %v140_v2 = vld [vmem:[%s115_s24 + $0x8] sm:$0xff]  ;;  %p225_p1 = scmp.eq.s32.totalorder %s387_s10, 3  ;;  %s357_s9 = smov [#allocation5]  }
  0x45   : > { %v142_v4 = vadd.f32 %v140_v2, %v139_v1  ;;  %s152_s20 = sshll.u32 %s357_s9, 4  ;;  %s153_s20 = int_to_ptr.vmem [resolvable:$true] %s152_s20 }
  0x46   : > { %s289_s15 = scalar_lea.vmem %s153_s20, 128  ;;  %p296_p4 = scmp.lt.s32.totalorder %s153_s20, %s153_s20 }
  0x47   : > { %p290_p6 = scmp.ne.s32.totalorder %s153_s20, %s289_s15  ;;  %p297_p5 = scmp.lt.s32.totalorder %s289_s15, %s289_s15 }
  0x49   : > { %p291_p2 = pnand %p290_p6, %p225_p1  ;;  %p298_p7 = por %p297_p5, %p296_p4 }
  0x4a   : > { %v141_v3 = vld [vmem:[#allocation5] sm:$0xff] }
  0x4b   : > { %v143_v5 = vadd.f32 %v142_v4, %v141_v3  ;;  %p292_p3 = pneg %p291_p2 }
  0x4d   : > { %144 = vst [vmem:[#allocation5] sm:$0xff] %v143_v5  ;;  %p299_p8 = pnand %p298_p7, %p292_p3 }
  0x4f   : > { %302 = shalt.err (!%p299_p8)
}
  0x50   : > { %222 = dma.vmem_to_hbm [thread:$0]  (%p225_p1), %s153_s20, 128, %s483_s1, [#allocation4]  }
  0x51   : > { %334 = dma.done.wait (%p225_p1), [#allocation4], 128  }
  0x52   : > { %336 = vsyncadd (%p225_p1), [#allocation4], 4294967168 }
  0x53 PF: > { %p12_p10 = scmp.ge.s32.totalorder %s390_s11, 6   ;;  %s485_s6 = smov %s343_s7 }
  0x54   : > { %s486_s7 = smov %s347_s8  ;;  %s487_s8 = smov %s400_s14 }
  0x55   : > { %s488_s9 = smov %s390_s11  ;;  %14 = sbr.rel (!%p12_p10) target bundleno = 4 (0x4), region = 65 }
  0x5a   :  { %165 = vsyncpa [#allocation3], 1 }
  0x5b   :  { %167 = vsyncpa [#allocation3 + $0x1], 1 }
  0x5c   :  { %168 = vsyncpa [#allocation4], 1 }
  0x5d   :  { %170 = vsyncpa [#allocation4 + $0x1], 1 }

</bundles_post_ra>
